<compile_context>
chip_gen: v6e
topology: v6e:2x2x1
jax: 0.10.0
libtpu: 0.0.40
codegen_flags: <defaults>
</compile_context>

<pallas_src>
import numpy as np

import jax
import jax.numpy as jnp
from jax.experimental import pallas as pl
from jax.experimental.pallas import tpu as pltpu


# ----------------------------------------------------------------------------
# One fused kernel: conv1+maxpool -> conv2+maxpool -> conv3+avgpool -> fc1 ->
# fc2 -> classifier.  Activation layout: batched 2-D slabs, rows =
# image*(H+2) + padded_h, lanes = w*Cin + c (channel-minor, no W padding).
# ----------------------------------------------------------------------------
def _fused_forward_kernel(x_ref, bands_ref, fcw_ref, bias_ref, o_ref,
                          p2_ref, p3_ref, ys_ref):
    n_img = o_ref.shape[0]
    num_classes = o_ref.shape[1]

    # Zero-fill next-layer buffers once: the zero border rows realize the
    # convs' H padding (W padding is folded into the banded weights).
    p2_ref[...] = jnp.zeros(p2_ref.shape, p2_ref.dtype)
    p3_ref[...] = jnp.zeros(p3_ref.shape, p3_ref.dtype)

    def conv_pool(src_ref, band_lo, bias_row, H, W, Cout, pool):
        # src_ref : (n_img*(H+2), W*Cin) bf16, channel-minor, zero H-padded.
        # Computes conv3x3(pad=1) + bias + ReLU + 2x2/stride-2 pooling for the
        # whole batch; returns per-image pooled blocks (H//2, (W//2)*Cout) f32.
        Hp = H + 2
        m_out = n_img * Hp - 2
        cols = W * Cout
        half = (W // 2) * Cout

        acc = jnp.zeros((m_out, cols), jnp.float32)
        for dy in range(3):                       # 3 MXU dots for the whole batch
            acc = acc + jnp.dot(src_ref[dy:dy + m_out, :],
                                bands_ref[dy, :, band_lo:band_lo + cols],
                                preferred_element_type=jnp.float32)
        y = jnp.maximum(acc + bias_ref[bias_row:bias_row + 1, :cols], 0.0)

        # W-direction pool: band output columns are permuted [even w | odd w],
        # so the two pooling halves are contiguous lane slabs.
        yw = (jnp.maximum(y[:, :half], y[:, half:]) if pool == "max"
              else y[:, :half] + y[:, half:])

        # H-direction pool: stage the slab once in VMEM, then read even / odd
        # rows with one strided load each per image (block ops, no row loop).
        ys_ref[0:m_out, 0:half] = yw
        blocks = []
        for n in range(n_img):
            ev = ys_ref[pl.ds(n * Hp, H // 2, 2), 0:half]
            od = ys_ref[pl.ds(n * Hp + 1, H // 2, 2), 0:half]
            blocks.append(jnp.maximum(ev, od) if pool == "max"
                          else (ev + od) * 0.25)
        return blocks

    # conv1 + maxpool -> conv2 padded interior (one block store per image).
    for n, blk in enumerate(conv_pool(x_ref, 0, 0, 16, 16, 8, "max")):
        p2_ref[n * 10 + 1:n * 10 + 9, :] = blk.astype(jnp.bfloat16)
    # conv2 + maxpool -> conv3 padded interior.
    for n, blk in enumerate(conv_pool(p2_ref, 128, 1, 8, 8, 16, "max")):
        p3_ref[n * 6 + 1:n * 6 + 5, :] = blk.astype(jnp.bfloat16)
    # conv3 + 2x2 avg-pool (adaptive avgpool to 2x2): keep the two pooled rows
    # per image in registers and feed fc1 directly (no feature scratch).
    blocks = conv_pool(p3_ref, 256, 2, 4, 4, 16, "avg")
    top = jnp.concatenate([b[0:1, :] for b in blocks], axis=0).astype(jnp.bfloat16)
    bot = jnp.concatenate([b[1:2, :] for b in blocks], axis=0).astype(jnp.bfloat16)

    # backbone.classifier MLP (last Linear = Identity) + self.classifier, on
    # MXU.  fc1 is split into its h'=0 / h'=1 row halves (no feature concat).
    h = (jnp.dot(top, fcw_ref[0:32, :], preferred_element_type=jnp.float32)
         + jnp.dot(bot, fcw_ref[32:64, :], preferred_element_type=jnp.float32)
         + bias_ref[3:4, 0:32])
    h = jnp.maximum(h, 0.0).astype(jnp.bfloat16)
    h = jnp.dot(h, fcw_ref[64:96, :],
                preferred_element_type=jnp.float32) + bias_ref[4:5, 0:32]
    h = jnp.maximum(h, 0.0).astype(jnp.bfloat16)
    logits = jnp.dot(h, fcw_ref[96:128, :],
                     preferred_element_type=jnp.float32) + bias_ref[5:6, 0:32]
    o_ref[...] = logits[:, :num_classes]


# ----------------------------------------------------------------------------
# Host-side (one-time) weight repacking.
# ----------------------------------------------------------------------------
def _band_weight(w_oihw, W):
    """(Cout,Cin,3,3) conv weight -> (3, W*Cin, W*Cout) banded matmul weights.

    Row (w_in*Cin + ci) of band dy, output column (perm(w_out)*Cout + co) holds
    w[co,ci,dy,dx] with w_in = w_out + dx - 1; out-of-range w_in entries are
    dropped, which realizes the conv's zero padding along W (so activation
    buffers need no lane padding).  Output w-columns are permuted
    [even w | odd w] so the 2x2 pool's W halves are contiguous lane slabs.
    """
    wt = np.asarray(w_oihw, np.float32)
    Cout, Cin = wt.shape[0], wt.shape[1]
    perm = list(range(0, W, 2)) + list(range(1, W, 2))
    bands = np.zeros((3, W, Cin, W, Cout), np.float32)
    for dy in range(3):
        for dx in range(3):
            blk = wt[:, :, dy, dx].T                      # (Cin, Cout)
            for w_out in range(W):
                w_in = w_out + dx - 1
                if 0 <= w_in < W:
                    bands[dy, w_in, :, w_out, :] = blk
    bands = bands[:, :, :, perm, :]
    return bands.reshape(3, W * Cin, W * Cout)


def prepare_params(params):
    """One-time repack of PyTorch-layout params into 3 packed kernel operands
    (cuts 13 input DMAs down to 3 + the image)."""
    num_classes = np.asarray(params["cls_w"]).shape[1]

    band1 = _band_weight(params["conv1_w"], 16)             # (3, 64, 128)
    band2 = _band_weight(params["conv2_w"], 8)               # (3, 64, 128)
    band3 = _band_weight(params["conv3_w"], 4)                # (3, 64,  64)
    bands = np.concatenate([band1, band2, band3], axis=2)     # (3, 64, 320)

    # Fold the torch (C,H,W)-order flatten into fc1's rows (kernel features are
    # in (h, w, c) order), pad the classifier to 32 columns, pack to (128, 32).
    perm = np.array([c * 4 + h * 2 + w
                     for h in range(2) for w in range(2) for c in range(16)],
                    np.int32)
    fc1_w = np.asarray(params["fc1_w"], np.float32)[perm]     # (64, 32)
    fc2_w = np.asarray(params["fc2_w"], np.float32)           # (32, 32)
    cls_w = np.zeros((32, 32), np.float32)
    cls_w[:, :num_classes] = np.asarray(params["cls_w"], np.float32)
    fcw = np.concatenate([fc1_w, fc2_w, cls_w], axis=0)       # (128, 32)

    # All biases in one (6, 128) f32 blob (conv biases pre-tiled per w block).
    biases = np.zeros((6, 128), np.float32)
    biases[0, :128] = np.tile(np.asarray(params["conv1_b"], np.float32), 16)
    biases[1, :128] = np.tile(np.asarray(params["conv2_b"], np.float32), 8)
    biases[2, :64] = np.tile(np.asarray(params["conv3_b"], np.float32), 4)
    biases[3, :32] = np.asarray(params["fc1_b"], np.float32)
    biases[4, :32] = np.asarray(params["fc2_b"], np.float32)
    biases[5, :num_classes] = np.asarray(params["cls_b"], np.float32)

    return {
        "bands": jnp.asarray(bands, jnp.bfloat16),
        "fcw": jnp.asarray(fcw, jnp.bfloat16),
        "biases": jnp.asarray(biases, jnp.float32),
    }


def cat_breed_classifier_forward(prep, x_nchw, num_classes=5):
    N, C, H, W = x_nchw.shape                                 # (2, 4, 16, 16)
    # Single boundary op (one XLA fusion): NCHW -> channel-minor rows
    # (lane = w*C + c), zero H-padding for conv1, bf16 cast.  Conv1's W padding
    # is folded into the banded weights, so no lane padding is needed.
    x = jnp.transpose(x_nchw, (0, 2, 3, 1)).reshape(N, H, W * C)
    x = jnp.pad(x, ((0, 0), (1, 1), (0, 0)))
    x = x.reshape(N * (H + 2), W * C).astype(jnp.bfloat16)

    # Whole forward in ONE pallas_call, no grid: everything fits in VMEM on
    # v5e/v6e/v7x with >60x headroom, so there is nothing to pipeline.
    # TODO(synk): for batch >= ~8, add a leading batch grid axis with
    # dimension_semantics=("parallel",) so v7x's two TensorCores split it.
    return pl.pallas_call(
        _fused_forward_kernel,
        out_shape=jax.ShapeDtypeStruct((N, num_classes), jnp.float32),
        scratch_shapes=[
            pltpu.VMEM((N * 10, 64), jnp.bfloat16),    # conv2 input, H-padded
            pltpu.VMEM((N * 6, 64), jnp.bfloat16),     # conv3 input, H-padded
            pltpu.VMEM((N * 18 - 2, 64), jnp.float32), # shared W-pooled staging
        ],
    )(x, prep["bands"], prep["fcw"], prep["biases"])


# ----------------------------------------------------------------------------
# Synthetic deterministic parameters and a pure-JAX reference for verification.
# ----------------------------------------------------------------------------
def init_params(key, num_classes=5, cin=4):
    ks = jax.random.split(key, 12)

    def w(k, shape, scale=0.05):
        return jax.random.normal(k, shape, jnp.float32) * scale

    return {
        "conv1_w": w(ks[0], (8, cin, 3, 3)),   "conv1_b": w(ks[1], (8,)),
        "conv2_w": w(ks[2], (16, 8, 3, 3)),    "conv2_b": w(ks[3], (16,)),
        "conv3_w": w(ks[4], (16, 16, 3, 3)),   "conv3_b": w(ks[5], (16,)),
        "fc1_w": w(ks[6], (64, 32)),           "fc1_b": w(ks[7], (32,)),
        "fc2_w": w(ks[8], (32, 32)),           "fc2_b": w(ks[9], (32,)),
        "cls_w": w(ks[10], (32, num_classes)), "cls_b": w(ks[11], (num_classes,)),
    }


def _reference_forward(params, x_nchw):
    """Pure-JAX f32 reference (im2col conv, reshape pooling)."""
    x = jnp.transpose(x_nchw, (0, 2, 3, 1)).astype(jnp.float32)

    def conv3x3_relu(x, w, b):
        N, H, W, Cin = x.shape
        xp = jnp.pad(x, ((0, 0), (1, 1), (1, 1), (0, 0)))
        patches = jnp.concatenate(
            [xp[:, dy:dy + H, dx:dx + W, :] for dy in range(3) for dx in range(3)],
            axis=-1)
        w2 = jnp.transpose(w, (2, 3, 1, 0)).reshape(9 * Cin, -1)
        y = patches.reshape(N * H * W, 9 * Cin) @ w2 + b
        return jnp.maximum(y, 0.0).reshape(N, H, W, -1)

    def pool(x, op):
        N, H, W, C = x.shape
        x = x.reshape(N, H // 2, 2, W // 2, 2, C)
        return x.max((2, 4)) if op == "max" else x.mean((2, 4))

    x = pool(conv3x3_relu(x, params["conv1_w"], params["conv1_b"]), "max")
    x = pool(conv3x3_relu(x, params["conv2_w"], params["conv2_b"]), "max")
    x = pool(conv3x3_relu(x, params["conv3_w"], params["conv3_b"]), "avg")
    N = x.shape[0]
    feats = jnp.transpose(x, (0, 3, 1, 2)).reshape(N, -1)      # (C,H,W) flatten
    feats = jnp.maximum(feats @ params["fc1_w"] + params["fc1_b"], 0.0)
    feats = jnp.maximum(feats @ params["fc2_w"] + params["fc2_b"], 0.0)
    return feats @ params["cls_w"] + params["cls_b"]


if __name__ == "__main__":
    key = jax.random.PRNGKey(0)
    kx, kp = jax.random.split(key)

    # Small NCHW input consistent with the module's forward (image tensor).
    x = jax.random.normal(kx, (2, 4, 16, 16), jnp.float32)
    params = init_params(kp, num_classes=5, cin=4)
    prep = prepare_params(params)                 # one-time host-side repack

    fwd = jax.jit(cat_breed_classifier_forward, static_argnames="num_classes")
    logits = fwd(prep, x, num_classes=5)
    jax.block_until_ready(logits)

    assert logits.shape == (2, 5), logits.shape
    assert logits.dtype == jnp.float32

    ref = _reference_forward(params, x)
    assert jnp.allclose(logits, ref, rtol=5e-2, atol=2e-2), (
        "max |diff| = %s" % jnp.max(jnp.abs(logits - ref)))
    print("KERNEL_OK")
</pallas_src>

<mosaic_0001>
module attributes {stable_mosaic.version = 11 : i64} {
  func.func @_fused_forward_kernel(%arg0: memref<36x64xbf16, #tpu.memory_space<vmem>>, %arg1: memref<3x64x320xbf16, #tpu.memory_space<vmem>>, %arg2: memref<128x32xbf16, #tpu.memory_space<vmem>>, %arg3: memref<6x128xf32, #tpu.memory_space<vmem>>, %arg4: memref<2x5xf32, #tpu.memory_space<vmem>>, %arg5: memref<20x64xbf16, #tpu.memory_space<vmem>>, %arg6: memref<12x64xbf16, #tpu.memory_space<vmem>>, %arg7: memref<34x64xf32, #tpu.memory_space<vmem>>) attributes {dimension_semantics = [], scalar_prefetch = 0 : i64, scratch_operands = 3 : i64, tpu.core_type = #tpu.core_type<tc>} {
    %cst = arith.constant 0.000000e+00 : bf16
    %0 = vector.broadcast %cst : bf16 to vector<20x64xbf16>
    %c0 = arith.constant 0 : index
    %c0_0 = arith.constant 0 : index
    %1 = vector.load %arg5[%c0, %c0_0] : memref<20x64xbf16, #tpu.memory_space<vmem>>, vector<20x64xbf16>
    tpu.vector_store %arg5[%c0, %c0_0], %0 {strides = array<i32>} : memref<20x64xbf16, #tpu.memory_space<vmem>>, vector<20x64xbf16>,
    %cst_1 = arith.constant 0.000000e+00 : bf16
    %2 = vector.broadcast %cst_1 : bf16 to vector<12x64xbf16>
    %c0_2 = arith.constant 0 : index
    %c0_3 = arith.constant 0 : index
    %3 = vector.load %arg6[%c0_2, %c0_3] : memref<12x64xbf16, #tpu.memory_space<vmem>>, vector<12x64xbf16>
    tpu.vector_store %arg6[%c0_2, %c0_3], %2 {strides = array<i32>} : memref<12x64xbf16, #tpu.memory_space<vmem>>, vector<12x64xbf16>,
    %cst_4 = arith.constant 0.000000e+00 : f32
    %4 = vector.broadcast %cst_4 : f32 to vector<34x128xf32>
    %c0_5 = arith.constant 0 : index
    %c0_6 = arith.constant 0 : index
    %5 = vector.load %arg0[%c0_5, %c0_6] : memref<36x64xbf16, #tpu.memory_space<vmem>>, vector<34x64xbf16>
    %c0_7 = arith.constant 0 : index
    %c0_8 = arith.constant 0 : index
    %c0_9 = arith.constant 0 : index
    %6 = vector.load %arg1[%c0_7, %c0_8, %c0_9] : memref<3x64x320xbf16, #tpu.memory_space<vmem>>, vector<1x64x128xbf16>
    %7 = vector.shape_cast %6 : vector<1x64x128xbf16> to vector<64x128xbf16>
    %cst_10 = arith.constant dense<0.000000e+00> : vector<34x128xf32>
    %8 = tpu.matmul %5, %7, %cst_10 {dimension_numbers = #tpu.dot_dimension_numbers<[1], [0], [0], [1], [0, 0, 1, 1], [], []>} : vector<34x64xbf16>, vector<64x128xbf16>, vector<34x128xf32> -> vector<34x128xf32>
    %9 = arith.addf %4, %8 : vector<34x128xf32>
    %c1 = arith.constant 1 : index
    %c0_11 = arith.constant 0 : index
    %10 = vector.load %arg0[%c1, %c0_11] : memref<36x64xbf16, #tpu.memory_space<vmem>>, vector<34x64xbf16>
    %c1_12 = arith.constant 1 : index
    %c0_13 = arith.constant 0 : index
    %c0_14 = arith.constant 0 : index
    %11 = vector.load %arg1[%c1_12, %c0_13, %c0_14] : memref<3x64x320xbf16, #tpu.memory_space<vmem>>, vector<1x64x128xbf16>
    %12 = vector.shape_cast %11 : vector<1x64x128xbf16> to vector<64x128xbf16>
    %cst_15 = arith.constant dense<0.000000e+00> : vector<34x128xf32>
    %13 = tpu.matmul %10, %12, %cst_15 {dimension_numbers = #tpu.dot_dimension_numbers<[1], [0], [0], [1], [0, 0, 1, 1], [], []>} : vector<34x64xbf16>, vector<64x128xbf16>, vector<34x128xf32> -> vector<34x128xf32>
    %14 = arith.addf %9, %13 : vector<34x128xf32>
    %c2 = arith.constant 2 : index
    %c0_16 = arith.constant 0 : index
    %15 = vector.load %arg0[%c2, %c0_16] : memref<36x64xbf16, #tpu.memory_space<vmem>>, vector<34x64xbf16>
    %c2_17 = arith.constant 2 : index
    %c0_18 = arith.constant 0 : index
    %c0_19 = arith.constant 0 : index
    %16 = vector.load %arg1[%c2_17, %c0_18, %c0_19] : memref<3x64x320xbf16, #tpu.memory_space<vmem>>, vector<1x64x128xbf16>
    %17 = vector.shape_cast %16 : vector<1x64x128xbf16> to vector<64x128xbf16>
    %cst_20 = arith.constant dense<0.000000e+00> : vector<34x128xf32>
    %18 = tpu.matmul %15, %17, %cst_20 {dimension_numbers = #tpu.dot_dimension_numbers<[1], [0], [0], [1], [0, 0, 1, 1], [], []>} : vector<34x64xbf16>, vector<64x128xbf16>, vector<34x128xf32> -> vector<34x128xf32>
    %19 = arith.addf %14, %18 : vector<34x128xf32>
    %c0_21 = arith.constant 0 : index
    %c0_22 = arith.constant 0 : index
    %20 = vector.load %arg3[%c0_21, %c0_22] : memref<6x128xf32, #tpu.memory_space<vmem>>, vector<1x128xf32>
    %21 = vector.broadcast %20 : vector<1x128xf32> to vector<34x128xf32>
    %22 = arith.addf %19, %21 : vector<34x128xf32>
    %cst_23 = arith.constant 0.000000e+00 : f32
    %23 = vector.broadcast %cst_23 : f32 to vector<34x128xf32>
    %24 = arith.maximumf %22, %23 : vector<34x128xf32>
    %25 = vector.extract_strided_slice %24 {offsets = [0, 0], sizes = [34, 64], strides = [1, 1]} : vector<34x128xf32> to vector<34x64xf32>
    %26 = vector.extract_strided_slice %24 {offsets = [0, 64], sizes = [34, 64], strides = [1, 1]} : vector<34x128xf32> to vector<34x64xf32>
    %27 = arith.maximumf %25, %26 : vector<34x64xf32>
    %c0_24 = arith.constant 0 : index
    %c0_25 = arith.constant 0 : index
    %28 = vector.load %arg7[%c0_24, %c0_25] : memref<34x64xf32, #tpu.memory_space<vmem>>, vector<34x64xf32>
    tpu.vector_store %arg7[%c0_24, %c0_25], %27 {strides = array<i32>} : memref<34x64xf32, #tpu.memory_space<vmem>>, vector<34x64xf32>,
    %c0_26 = arith.constant 0 : index
    %c0_27 = arith.constant 0 : index
    %29 = tpu.strided_load %arg7[%c0_26, %c0_27] {strides = array<i32: 2, 1>} : memref<34x64xf32, #tpu.memory_space<vmem>>, vector<8x64xf32>
    %c1_28 = arith.constant 1 : index
    %c0_29 = arith.constant 0 : index
    %30 = tpu.strided_load %arg7[%c1_28, %c0_29] {strides = array<i32: 2, 1>} : memref<34x64xf32, #tpu.memory_space<vmem>>, vector<8x64xf32>
    %31 = arith.maximumf %29, %30 : vector<8x64xf32>
    %c18 = arith.constant 18 : index
    %c0_30 = arith.constant 0 : index
    %32 = tpu.strided_load %arg7[%c18, %c0_30] {strides = array<i32: 2, 1>} : memref<34x64xf32, #tpu.memory_space<vmem>>, vector<8x64xf32>
    %c19 = arith.constant 19 : index
    %c0_31 = arith.constant 0 : index
    %33 = tpu.strided_load %arg7[%c19, %c0_31] {strides = array<i32: 2, 1>} : memref<34x64xf32, #tpu.memory_space<vmem>>, vector<8x64xf32>
    %34 = arith.maximumf %32, %33 : vector<8x64xf32>
    %35 = arith.truncf %31 : vector<8x64xf32> to vector<8x64xbf16>
    %c1_32 = arith.constant 1 : index
    %c0_33 = arith.constant 0 : index
    %36 = vector.load %arg5[%c1_32, %c0_33] : memref<20x64xbf16, #tpu.memory_space<vmem>>, vector<8x64xbf16>
    tpu.vector_store %arg5[%c1_32, %c0_33], %35 {strides = array<i32>} : memref<20x64xbf16, #tpu.memory_space<vmem>>, vector<8x64xbf16>,
    %37 = arith.truncf %34 : vector<8x64xf32> to vector<8x64xbf16>
    %c11 = arith.constant 11 : index
    %c0_34 = arith.constant 0 : index
    %38 = vector.load %arg5[%c11, %c0_34] : memref<20x64xbf16, #tpu.memory_space<vmem>>, vector<8x64xbf16>
    tpu.vector_store %arg5[%c11, %c0_34], %37 {strides = array<i32>} : memref<20x64xbf16, #tpu.memory_space<vmem>>, vector<8x64xbf16>,
    %cst_35 = arith.constant 0.000000e+00 : f32
    %39 = vector.broadcast %cst_35 : f32 to vector<18x128xf32>
    %c0_36 = arith.constant 0 : index
    %c0_37 = arith.constant 0 : index
    %40 = vector.load %arg5[%c0_36, %c0_37] : memref<20x64xbf16, #tpu.memory_space<vmem>>, vector<18x64xbf16>
    %c0_38 = arith.constant 0 : index
    %c0_39 = arith.constant 0 : index
    %c128 = arith.constant 128 : index
    %41 = vector.load %arg1[%c0_38, %c0_39, %c128] : memref<3x64x320xbf16, #tpu.memory_space<vmem>>, vector<1x64x128xbf16>
    %42 = vector.shape_cast %41 : vector<1x64x128xbf16> to vector<64x128xbf16>
    %cst_40 = arith.constant dense<0.000000e+00> : vector<18x128xf32>
    %43 = tpu.matmul %40, %42, %cst_40 {dimension_numbers = #tpu.dot_dimension_numbers<[1], [0], [0], [1], [0, 0, 1, 1], [], []>} : vector<18x64xbf16>, vector<64x128xbf16>, vector<18x128xf32> -> vector<18x128xf32>
    %44 = arith.addf %39, %43 : vector<18x128xf32>
    %c1_41 = arith.constant 1 : index
    %c0_42 = arith.constant 0 : index
    %45 = vector.load %arg5[%c1_41, %c0_42] : memref<20x64xbf16, #tpu.memory_space<vmem>>, vector<18x64xbf16>
    %c1_43 = arith.constant 1 : index
    %c0_44 = arith.constant 0 : index
    %c128_45 = arith.constant 128 : index
    %46 = vector.load %arg1[%c1_43, %c0_44, %c128_45] : memref<3x64x320xbf16, #tpu.memory_space<vmem>>, vector<1x64x128xbf16>
    %47 = vector.shape_cast %46 : vector<1x64x128xbf16> to vector<64x128xbf16>
    %cst_46 = arith.constant dense<0.000000e+00> : vector<18x128xf32>
    %48 = tpu.matmul %45, %47, %cst_46 {dimension_numbers = #tpu.dot_dimension_numbers<[1], [0], [0], [1], [0, 0, 1, 1], [], []>} : vector<18x64xbf16>, vector<64x128xbf16>, vector<18x128xf32> -> vector<18x128xf32>
    %49 = arith.addf %44, %48 : vector<18x128xf32>
    %c2_47 = arith.constant 2 : index
    %c0_48 = arith.constant 0 : index
    %50 = vector.load %arg5[%c2_47, %c0_48] : memref<20x64xbf16, #tpu.memory_space<vmem>>, vector<18x64xbf16>
    %c2_49 = arith.constant 2 : index
    %c0_50 = arith.constant 0 : index
    %c128_51 = arith.constant 128 : index
    %51 = vector.load %arg1[%c2_49, %c0_50, %c128_51] : memref<3x64x320xbf16, #tpu.memory_space<vmem>>, vector<1x64x128xbf16>
    %52 = vector.shape_cast %51 : vector<1x64x128xbf16> to vector<64x128xbf16>
    %cst_52 = arith.constant dense<0.000000e+00> : vector<18x128xf32>
    %53 = tpu.matmul %50, %52, %cst_52 {dimension_numbers = #tpu.dot_dimension_numbers<[1], [0], [0], [1], [0, 0, 1, 1], [], []>} : vector<18x64xbf16>, vector<64x128xbf16>, vector<18x128xf32> -> vector<18x128xf32>
    %54 = arith.addf %49, %53 : vector<18x128xf32>
    %c1_53 = arith.constant 1 : index
    %c0_54 = arith.constant 0 : index
    %55 = vector.load %arg3[%c1_53, %c0_54] : memref<6x128xf32, #tpu.memory_space<vmem>>, vector<1x128xf32>
    %56 = vector.broadcast %55 : vector<1x128xf32> to vector<18x128xf32>
    %57 = arith.addf %54, %56 : vector<18x128xf32>
    %cst_55 = arith.constant 0.000000e+00 : f32
    %58 = vector.broadcast %cst_55 : f32 to vector<18x128xf32>
    %59 = arith.maximumf %57, %58 : vector<18x128xf32>
    %60 = vector.extract_strided_slice %59 {offsets = [0, 0], sizes = [18, 64], strides = [1, 1]} : vector<18x128xf32> to vector<18x64xf32>
    %61 = vector.extract_strided_slice %59 {offsets = [0, 64], sizes = [18, 64], strides = [1, 1]} : vector<18x128xf32> to vector<18x64xf32>
    %62 = arith.maximumf %60, %61 : vector<18x64xf32>
    %c0_56 = arith.constant 0 : index
    %c0_57 = arith.constant 0 : index
    %63 = vector.load %arg7[%c0_56, %c0_57] : memref<34x64xf32, #tpu.memory_space<vmem>>, vector<18x64xf32>
    tpu.vector_store %arg7[%c0_56, %c0_57], %62 {strides = array<i32>} : memref<34x64xf32, #tpu.memory_space<vmem>>, vector<18x64xf32>,
    %c0_58 = arith.constant 0 : index
    %c0_59 = arith.constant 0 : index
    %64 = tpu.strided_load %arg7[%c0_58, %c0_59] {strides = array<i32: 2, 1>} : memref<34x64xf32, #tpu.memory_space<vmem>>, vector<4x64xf32>
    %c1_60 = arith.constant 1 : index
    %c0_61 = arith.constant 0 : index
    %65 = tpu.strided_load %arg7[%c1_60, %c0_61] {strides = array<i32: 2, 1>} : memref<34x64xf32, #tpu.memory_space<vmem>>, vector<4x64xf32>
    %66 = arith.maximumf %64, %65 : vector<4x64xf32>
    %c10 = arith.constant 10 : index
    %c0_62 = arith.constant 0 : index
    %67 = tpu.strided_load %arg7[%c10, %c0_62] {strides = array<i32: 2, 1>} : memref<34x64xf32, #tpu.memory_space<vmem>>, vector<4x64xf32>
    %c11_63 = arith.constant 11 : index
    %c0_64 = arith.constant 0 : index
    %68 = tpu.strided_load %arg7[%c11_63, %c0_64] {strides = array<i32: 2, 1>} : memref<34x64xf32, #tpu.memory_space<vmem>>, vector<4x64xf32>
    %69 = arith.maximumf %67, %68 : vector<4x64xf32>
    %70 = arith.truncf %66 : vector<4x64xf32> to vector<4x64xbf16>
    %c1_65 = arith.constant 1 : index
    %c0_66 = arith.constant 0 : index
    %71 = vector.load %arg6[%c1_65, %c0_66] : memref<12x64xbf16, #tpu.memory_space<vmem>>, vector<4x64xbf16>
    tpu.vector_store %arg6[%c1_65, %c0_66], %70 {strides = array<i32>} : memref<12x64xbf16, #tpu.memory_space<vmem>>, vector<4x64xbf16>,
    %72 = arith.truncf %69 : vector<4x64xf32> to vector<4x64xbf16>
    %c7 = arith.constant 7 : index
    %c0_67 = arith.constant 0 : index
    %73 = vector.load %arg6[%c7, %c0_67] : memref<12x64xbf16, #tpu.memory_space<vmem>>, vector<4x64xbf16>
    tpu.vector_store %arg6[%c7, %c0_67], %72 {strides = array<i32>} : memref<12x64xbf16, #tpu.memory_space<vmem>>, vector<4x64xbf16>,
    %cst_68 = arith.constant 0.000000e+00 : f32
    %74 = vector.broadcast %cst_68 : f32 to vector<10x64xf32>
    %c0_69 = arith.constant 0 : index
    %c0_70 = arith.constant 0 : index
    %75 = vector.load %arg6[%c0_69, %c0_70] : memref<12x64xbf16, #tpu.memory_space<vmem>>, vector<10x64xbf16>
    %c0_71 = arith.constant 0 : index
    %c0_72 = arith.constant 0 : index
    %c256 = arith.constant 256 : index
    %76 = vector.load %arg1[%c0_71, %c0_72, %c256] : memref<3x64x320xbf16, #tpu.memory_space<vmem>>, vector<1x64x64xbf16>
    %77 = vector.shape_cast %76 : vector<1x64x64xbf16> to vector<64x64xbf16>
    %cst_73 = arith.constant dense<0.000000e+00> : vector<10x64xf32>
    %78 = tpu.matmul %75, %77, %cst_73 {dimension_numbers = #tpu.dot_dimension_numbers<[1], [0], [0], [1], [0, 0, 1, 1], [], []>} : vector<10x64xbf16>, vector<64x64xbf16>, vector<10x64xf32> -> vector<10x64xf32>
    %79 = arith.addf %74, %78 : vector<10x64xf32>
    %c1_74 = arith.constant 1 : index
    %c0_75 = arith.constant 0 : index
    %80 = vector.load %arg6[%c1_74, %c0_75] : memref<12x64xbf16, #tpu.memory_space<vmem>>, vector<10x64xbf16>
    %c1_76 = arith.constant 1 : index
    %c0_77 = arith.constant 0 : index
    %c256_78 = arith.constant 256 : index
    %81 = vector.load %arg1[%c1_76, %c0_77, %c256_78] : memref<3x64x320xbf16, #tpu.memory_space<vmem>>, vector<1x64x64xbf16>
    %82 = vector.shape_cast %81 : vector<1x64x64xbf16> to vector<64x64xbf16>
    %cst_79 = arith.constant dense<0.000000e+00> : vector<10x64xf32>
    %83 = tpu.matmul %80, %82, %cst_79 {dimension_numbers = #tpu.dot_dimension_numbers<[1], [0], [0], [1], [0, 0, 1, 1], [], []>} : vector<10x64xbf16>, vector<64x64xbf16>, vector<10x64xf32> -> vector<10x64xf32>
    %84 = arith.addf %79, %83 : vector<10x64xf32>
    %c2_80 = arith.constant 2 : index
    %c0_81 = arith.constant 0 : index
    %85 = vector.load %arg6[%c2_80, %c0_81] : memref<12x64xbf16, #tpu.memory_space<vmem>>, vector<10x64xbf16>
    %c2_82 = arith.constant 2 : index
    %c0_83 = arith.constant 0 : index
    %c256_84 = arith.constant 256 : index
    %86 = vector.load %arg1[%c2_82, %c0_83, %c256_84] : memref<3x64x320xbf16, #tpu.memory_space<vmem>>, vector<1x64x64xbf16>
    %87 = vector.shape_cast %86 : vector<1x64x64xbf16> to vector<64x64xbf16>
    %cst_85 = arith.constant dense<0.000000e+00> : vector<10x64xf32>
    %88 = tpu.matmul %85, %87, %cst_85 {dimension_numbers = #tpu.dot_dimension_numbers<[1], [0], [0], [1], [0, 0, 1, 1], [], []>} : vector<10x64xbf16>, vector<64x64xbf16>, vector<10x64xf32> -> vector<10x64xf32>
    %89 = arith.addf %84, %88 : vector<10x64xf32>
    %c2_86 = arith.constant 2 : index
    %c0_87 = arith.constant 0 : index
    %90 = vector.load %arg3[%c2_86, %c0_87] : memref<6x128xf32, #tpu.memory_space<vmem>>, vector<1x64xf32>
    %91 = vector.broadcast %90 : vector<1x64xf32> to vector<10x64xf32>
    %92 = arith.addf %89, %91 : vector<10x64xf32>
    %cst_88 = arith.constant 0.000000e+00 : f32
    %93 = vector.broadcast %cst_88 : f32 to vector<10x64xf32>
    %94 = arith.maximumf %92, %93 : vector<10x64xf32>
    %95 = vector.extract_strided_slice %94 {offsets = [0, 0], sizes = [10, 32], strides = [1, 1]} : vector<10x64xf32> to vector<10x32xf32>
    %96 = vector.extract_strided_slice %94 {offsets = [0, 32], sizes = [10, 32], strides = [1, 1]} : vector<10x64xf32> to vector<10x32xf32>
    %97 = arith.addf %95, %96 : vector<10x32xf32>
    %c0_89 = arith.constant 0 : index
    %c0_90 = arith.constant 0 : index
    %98 = vector.load %arg7[%c0_89, %c0_90] : memref<34x64xf32, #tpu.memory_space<vmem>>, vector<10x32xf32>
    tpu.vector_store %arg7[%c0_89, %c0_90], %97 {strides = array<i32>} : memref<34x64xf32, #tpu.memory_space<vmem>>, vector<10x32xf32>,
    %c0_91 = arith.constant 0 : index
    %c0_92 = arith.constant 0 : index
    %99 = tpu.strided_load %arg7[%c0_91, %c0_92] {strides = array<i32: 2, 1>} : memref<34x64xf32, #tpu.memory_space<vmem>>, vector<2x32xf32>
    %c1_93 = arith.constant 1 : index
    %c0_94 = arith.constant 0 : index
    %100 = tpu.strided_load %arg7[%c1_93, %c0_94] {strides = array<i32: 2, 1>} : memref<34x64xf32, #tpu.memory_space<vmem>>, vector<2x32xf32>
    %101 = arith.addf %99, %100 : vector<2x32xf32>
    %cst_95 = arith.constant 2.500000e-01 : f32
    %102 = vector.broadcast %cst_95 : f32 to vector<2x32xf32>
    %103 = arith.mulf %101, %102 : vector<2x32xf32>
    %c6 = arith.constant 6 : index
    %c0_96 = arith.constant 0 : index
    %104 = tpu.strided_load %arg7[%c6, %c0_96] {strides = array<i32: 2, 1>} : memref<34x64xf32, #tpu.memory_space<vmem>>, vector<2x32xf32>
    %c7_97 = arith.constant 7 : index
    %c0_98 = arith.constant 0 : index
    %105 = tpu.strided_load %arg7[%c7_97, %c0_98] {strides = array<i32: 2, 1>} : memref<34x64xf32, #tpu.memory_space<vmem>>, vector<2x32xf32>
    %106 = arith.addf %104, %105 : vector<2x32xf32>
    %cst_99 = arith.constant 2.500000e-01 : f32
    %107 = vector.broadcast %cst_99 : f32 to vector<2x32xf32>
    %108 = arith.mulf %106, %107 : vector<2x32xf32>
    %109 = vector.extract_strided_slice %103 {offsets = [0, 0], sizes = [1, 32], strides = [1, 1]} : vector<2x32xf32> to vector<1x32xf32>
    %110 = vector.extract_strided_slice %108 {offsets = [0, 0], sizes = [1, 32], strides = [1, 1]} : vector<2x32xf32> to vector<1x32xf32>
    %111 = tpu.concatenate %109, %110 in 0 : vector<1x32xf32>, vector<1x32xf32> -> vector<2x32xf32>
    %112 = arith.truncf %111 : vector<2x32xf32> to vector<2x32xbf16>
    %113 = vector.extract_strided_slice %103 {offsets = [1, 0], sizes = [1, 32], strides = [1, 1]} : vector<2x32xf32> to vector<1x32xf32>
    %114 = vector.extract_strided_slice %108 {offsets = [1, 0], sizes = [1, 32], strides = [1, 1]} : vector<2x32xf32> to vector<1x32xf32>
    %115 = tpu.concatenate %113, %114 in 0 : vector<1x32xf32>, vector<1x32xf32> -> vector<2x32xf32>
    %116 = arith.truncf %115 : vector<2x32xf32> to vector<2x32xbf16>
    %c0_100 = arith.constant 0 : index
    %c0_101 = arith.constant 0 : index
    %117 = vector.load %arg2[%c0_100, %c0_101] : memref<128x32xbf16, #tpu.memory_space<vmem>>, vector<32x32xbf16>
    %cst_102 = arith.constant dense<0.000000e+00> : vector<2x32xf32>
    %118 = tpu.matmul %112, %117, %cst_102 {dimension_numbers = #tpu.dot_dimension_numbers<[1], [0], [0], [1], [0, 0, 1, 1], [], []>} : vector<2x32xbf16>, vector<32x32xbf16>, vector<2x32xf32> -> vector<2x32xf32>
    %c32 = arith.constant 32 : index
    %c0_103 = arith.constant 0 : index
    %119 = vector.load %arg2[%c32, %c0_103] : memref<128x32xbf16, #tpu.memory_space<vmem>>, vector<32x32xbf16>
    %cst_104 = arith.constant dense<0.000000e+00> : vector<2x32xf32>
    %120 = tpu.matmul %116, %119, %cst_104 {dimension_numbers = #tpu.dot_dimension_numbers<[1], [0], [0], [1], [0, 0, 1, 1], [], []>} : vector<2x32xbf16>, vector<32x32xbf16>, vector<2x32xf32> -> vector<2x32xf32>
    %121 = arith.addf %118, %120 : vector<2x32xf32>
    %c3 = arith.constant 3 : index
    %c0_105 = arith.constant 0 : index
    %122 = vector.load %arg3[%c3, %c0_105] : memref<6x128xf32, #tpu.memory_space<vmem>>, vector<1x32xf32>
    %123 = vector.broadcast %122 : vector<1x32xf32> to vector<2x32xf32>
    %124 = arith.addf %121, %123 : vector<2x32xf32>
    %cst_106 = arith.constant 0.000000e+00 : f32
    %125 = vector.broadcast %cst_106 : f32 to vector<2x32xf32>
    %126 = arith.maximumf %124, %125 : vector<2x32xf32>
    %127 = arith.truncf %126 : vector<2x32xf32> to vector<2x32xbf16>
    %c64 = arith.constant 64 : index
    %c0_107 = arith.constant 0 : index
    %128 = vector.load %arg2[%c64, %c0_107] : memref<128x32xbf16, #tpu.memory_space<vmem>>, vector<32x32xbf16>
    %cst_108 = arith.constant dense<0.000000e+00> : vector<2x32xf32>
    %129 = tpu.matmul %127, %128, %cst_108 {dimension_numbers = #tpu.dot_dimension_numbers<[1], [0], [0], [1], [0, 0, 1, 1], [], []>} : vector<2x32xbf16>, vector<32x32xbf16>, vector<2x32xf32> -> vector<2x32xf32>
    %c4 = arith.constant 4 : index
    %c0_109 = arith.constant 0 : index
    %130 = vector.load %arg3[%c4, %c0_109] : memref<6x128xf32, #tpu.memory_space<vmem>>, vector<1x32xf32>
    %131 = vector.broadcast %130 : vector<1x32xf32> to vector<2x32xf32>
    %132 = arith.addf %129, %131 : vector<2x32xf32>
    %cst_110 = arith.constant 0.000000e+00 : f32
    %133 = vector.broadcast %cst_110 : f32 to vector<2x32xf32>
    %134 = arith.maximumf %132, %133 : vector<2x32xf32>
    %135 = arith.truncf %134 : vector<2x32xf32> to vector<2x32xbf16>
    %c96 = arith.constant 96 : index
    %c0_111 = arith.constant 0 : index
    %136 = vector.load %arg2[%c96, %c0_111] : memref<128x32xbf16, #tpu.memory_space<vmem>>, vector<32x32xbf16>
    %cst_112 = arith.constant dense<0.000000e+00> : vector<2x32xf32>
    %137 = tpu.matmul %135, %136, %cst_112 {dimension_numbers = #tpu.dot_dimension_numbers<[1], [0], [0], [1], [0, 0, 1, 1], [], []>} : vector<2x32xbf16>, vector<32x32xbf16>, vector<2x32xf32> -> vector<2x32xf32>
    %c5 = arith.constant 5 : index
    %c0_113 = arith.constant 0 : index
    %138 = vector.load %arg3[%c5, %c0_113] : memref<6x128xf32, #tpu.memory_space<vmem>>, vector<1x32xf32>
    %139 = vector.broadcast %138 : vector<1x32xf32> to vector<2x32xf32>
    %140 = arith.addf %137, %139 : vector<2x32xf32>
    %141 = vector.extract_strided_slice %140 {offsets = [0, 0], sizes = [2, 5], strides = [1, 1]} : vector<2x32xf32> to vector<2x5xf32>
    %c0_114 = arith.constant 0 : index
    %c0_115 = arith.constant 0 : index
    %142 = vector.load %arg4[%c0_114, %c0_115] : memref<2x5xf32, #tpu.memory_space<vmem>>, vector<2x5xf32>
    tpu.vector_store %arg4[%c0_114, %c0_115], %141 {strides = array<i32>} : memref<2x5xf32, #tpu.memory_space<vmem>>, vector<2x5xf32>,
    return
  }
}

</mosaic_0001>

<bundles_post_ra>
// kernel: cat_breed_classifier_forward.1
= control target key start
LH: loop header
LB: loop body
LE: loop exit
PB: predicated region body
PF: predicated region fallthrough
CT: control target
= control target key end

     0   :  { %v1885_v0 = vmov 0.0   ;;  %vm1886_vm0 = vmmov 0   ;;  %vm62_vm1 = vsmask.f32 7424  ;;  %vm110_vm2 = vcmask 523264   ;;  %s2225_s0 = inlined_call_operand.vmem [shape: bf16[36,64], index: 0, kind: input, shape index: {}]   ;;  %s2226_s1 = inlined_call_operand.vmem [shape: bf16[3,64,320], index: 1, kind: input, shape index: {}]   ;;  %s2227_s2 = inlined_call_operand.vmem [shape: bf16[128,32], index: 2, kind: input, shape index: {}]   ;;  %s2228_s3 = inlined_call_operand.vmem [shape: f32[6,128], index: 3, kind: input, shape index: {}]   ;;  %s2229_s4 = inlined_call_operand.hbm [shape: f32[2,5], index: 4, kind: output, shape index: {}]  }
   0x1   :  { %1637 = vmatprep.subr.bf16.mxu0 %v1885_v0  ;;  %1657 = vmatprep.subr.bf16.mxu1 %v1885_v0  ;;  %v1807_v1 = vld [vmem:[%s2226_s1 + $0xa8] ss:$12 sps:$4 sm:$0xff]   ;;  %v1809_v3 = vld [vmem:[%s2226_s1 + $0x90] ss:$12 sps:$4 sm:$0xff]   ;;  %v1811_v5 = vld [vmem:[%s2226_s1 + $0x78] ss:$12 sps:$4 sm:$0xff]  }
   0x2   :  { %v1808_v2 = vld [vmem:[%s2226_s1 + $0x48] ss:$12 sps:$4 sm:$0xff]   ;;  %1645 = vmatprep.mubr.msk.bf16.mxu0 %vm1886_vm0, %v1885_v0  ;;  %1665 = vmatprep.mubr.msk.bf16.mxu1 %vm1886_vm0, %v1885_v0  ;;  %v1810_v4 = vld [vmem:[%s2226_s1 + $0x30] ss:$12 sps:$4 sm:$0xff]   ;;  %v1812_v6 = vld [vmem:[%s2226_s1 + $0x18] ss:$12 sps:$4 sm:$0xff]  }
   0x3   :  { %1638 = vmatpush3.bf16.msra.mxu0 %v1807_v1  ;;  %1658 = vmatpush3.bf16.msra.mxu1 %v1808_v2  ;;  %v26_v7 = vld [vmem:[%s2225_s0] sm:$0xf]  ;;  %v27_v8 = vld [vmem:[%s2225_s0 + $0x4] sm:$0xf]  ;;  %v1816_v10 = vld [vmem:[%s2225_s0 + $0x8] sm:$0xff]   ;;  %vm279_vm3 = vcmask 1046528  }
   0x4   :  { %1639 = vmatprep.subr.bf16.mxu0 %v1885_v0  ;;  %1659 = vmatprep.subr.bf16.mxu1 %v1885_v0  ;;  %v1439_v9 = vcombine.low %v26_v7, %v27_v8  ;;  %v1813_v11 = vld [vmem:[%s2226_s1 + $0x60] ss:$12 sps:$4 sm:$0xff]   ;;  %v71_v15 = vshll.u32 %v1816_v10, 16  ;;  %v1817_v18 = vld [vmem:[%s2226_s1 + $0x108] ss:$12 sps:$4 sm:$0xff]   ;;  %v75_v21 = vshrl.u32 %v1816_v10, 16 }
   0x5   :  { %v1814_v12 = vld [vmem:[%s2226_s1] ss:$12 sps:$4 sm:$0xff]   ;;  %v1819_v19 = vld [vmem:[%s2225_s0 + $0x10] ss:$0 sps:$4 sm:$0x33]   ;;  %v281_v31 = vrot.slane %v1816_v10, 1 }
   0x6   :  { %v64_v13 = vshrl.u32 %v1439_v9, 16  ;;  %v66_v14 = vshll.u32 %v1439_v9, 16  ;;  %v73_v17 = vrot.slane %v71_v15, 1  ;;  %v79_v22 = vshll.u32 %v1819_v19, 16  ;;  %v1818_v24 = vld [vmem:[%s2226_s1 + $0xf0] ss:$12 sps:$4 sm:$0xff]  }
   0x7   :  { %1640 = vmatpush3.bf16.msra.mxu0 %v1809_v3  ;;  %1660 = vmatpush3.bf16.msra.mxu1 %v1810_v4  ;;  %v266_v25 = vld [vmem:[%s2225_s0] sm:$0xe]  ;;  %v83_v27 = vshrl.u32 %v1819_v19, 16  ;;  %v1820_v32 = vld [vmem:[%s2226_s1 + $0xd8] ss:$12 sps:$4 sm:$0xff]  }
   0x8   :  { %1641 = vmatprep.subr.bf16.mxu0 %v1885_v0  ;;  %1661 = vmatprep.subr.bf16.mxu1 %v1885_v0  ;;  %v68_v16 = vrot.slane %v66_v14, 1  ;;  %v81_v26 = vrot.slane %v79_v22, 1  ;;  %v1465_v28 = vcombine.low %v266_v25, %v27_v8  ;;  %v77_v29 = vor.u32 %v75_v21, %v73_v17  ;;  %v1822_v34 = vld [vmem:[%s2226_s1 + $0xc0] ss:$12 sps:$4 sm:$0xff]  }
   0x9   :  { %v1821_v35 = vld [vmem:[%s2225_s0 + $0x10] ss:$0 sps:$4 sm:$0x11]  }
   0xa   :  { %v69_v20 = vor.u32 %v68_v16, %v64_v13  ;;  %v280_v30 = vrot.slane %v1465_v28, 1  ;;  %v82_v33 = vsel %vm62_vm1, %v77_v29, %v81_v26  ;;  %v85_v36 = vor.u32 %v83_v27, %v81_v26 }
   0xb   :  { %1642 = vmatpush3.bf16.msra.mxu0 %v1811_v5  ;;  %1662 = vmatpush3.bf16.msra.mxu1 %v1812_v6 }
   0xc   :  { %1643 = vmatprep.subr.bf16.mxu0 %v1885_v0  ;;  %1663 = vmatprep.subr.bf16.mxu1 %v1885_v0  ;;  %v74_v23 = vsel %vm62_vm1, %v69_v20, %v73_v17  ;;  %v282_v37 = vsel %vm279_vm3, %v280_v30, %v281_v31 }
   0xf   :  { %1644 = vmatpush3.bf16.msra.mxu0 %v1813_v11  ;;  %1664 = vmatpush3.bf16.msra.mxu1 %v1814_v12 }
  0x10   :  { %1677 = vmatprep.subr.bf16.mxu0 %v1885_v0 }
  0x12   :  { %1646 = vmatmul.mubr.msk.bf16.vlgmr.msra.gmra.mxu0 %vm110_vm2, %v74_v23  ;;  %1666 = vmatmul.mubr.msk.bf16.vlgmr.msra.gmra.mxu1 %vm110_vm2, %v1439_v9 }
  0x13   :  { %1678 = vmatpush3.bf16.msra.mxu0 %v1817_v18  ;;  %1649 = vmatprep.mubr.msk.bf16.mxu0 %vm1886_vm0, %v1885_v0 }
  0x14   :  { %1679 = vmatprep.subr.bf16.mxu0 %v1885_v0  ;;  %1669 = vmatprep.mubr.msk.bf16.mxu1 %vm1886_vm0, %v1885_v0 }
  0x17   :  { %1680 = vmatpush3.bf16.msra.mxu0 %v1818_v24 }
  0x18   :  { %1681 = vmatprep.subr.bf16.mxu0 %v1885_v0 }
  0x1a   :  { %1650 = vmatmul.mubr.msk.bf16.gmra.mxu0 %vm110_vm2, %v82_v33  ;;  %1670 = vmatmul.mubr.msk.bf16.gmra.mxu1 %vm110_vm2, %v1816_v10 }
  0x1b   :  { %1682 = vmatpush3.bf16.msra.mxu0 %v1820_v32  ;;  %1653 = vmatprep.mubr.msk.bf16.mxu0 %vm1886_vm0, %v1885_v0 }
  0x1c   :  { %1673 = vmatprep.mubr.msk.bf16.mxu1 %vm1886_vm0, %v1885_v0  ;;  %1683 = vmatprep.subr.bf16.mxu0 %v1885_v0 }
  0x1f   :  { %1684 = vmatpush3.bf16.msra.mxu0 %v1822_v34 }
  0x22   :  { %1654 = vmatmul.mubr.msk.bf16.gmra.mxu0 %vm110_vm2, %v85_v36  ;;  %1674 = vmatmul.mubr.msk.bf16.gmra.mxu1 %vm110_vm2, %v1821_v35 }
  0x23   :  { %1685 = vmatprep.mubr.msk.bf16.mxu0 %vm1886_vm0, %v1885_v0 }
  0x24   :  { %9 = vsyncpa [#allocation6], 0  ;;  %v283_v38 = vrot.slane %v1819_v19, 1  ;;  %v1473_v3 = vld [vmem:[%s2228_s3] ss:$0 sm:$0xff]  ;;  %s1887_s26 = smov 64  }
  0x25   :  { %vm19_vm4 = vcmask 519168   ;;  %v1888_v20 = vmov 0   ;;  %vm22_vm5 = vcmask 517120   ;;  %v1826_v35 = vld [vmem:[%s2226_s1 + $0x10c] ss:$12 sps:$4 sm:$0xff]   ;;  %vm453_vm6 = vcmask 516096  }
  0x26   :  { %v284_v39 = vsel %vm279_vm3, %v281_v31, %v283_v38  ;;  %20 = vst.msk [vmem:[#allocation2] sm:$0xf] %vm19_vm4, %v1888_v20  ;;  %21 = vst.msk [vmem:[#allocation2 + $0x4] sm:$0xf] %vm19_vm4, %v1888_v20  ;;  %v1824_v36 = vld [vmem:[%s2226_s1 + $0xac] ss:$12 sps:$4 sm:$0xff]   ;;  %1721 = vmatprep.subr.bf16.mxu0 %v1826_v35 }
  0x27   :  { %24 = vst.msk [vmem:[#allocation3] sm:$0xf] %vm19_vm4, %v1888_v20  ;;  %1697 = vmatprep.subr.bf16.mxu1 %v1824_v36  ;;  %vm454_vm7 = vsmask.f32 256  ;;  %vm448_vm8 = vsmask.f32 7938 }
  0x28   :  { %23 = vst.msk [vmem:[#allocation2 + $0x8] sm:$0x3] %vm22_vm5, %v1888_v20  ;;  %25 = vst.msk [vmem:[#allocation3 + $0x4] sm:$0x3] %vm22_vm5, %v1888_v20  ;;  %1698 = vmatpush3.bf16.msra.mxu1 %v1824_v36  ;;  %vm474_vm11 = vcmask 519169   ;;  %s1889_s29 = smov 96  }
  0x29   :  { %vm455_vm9 = vmand %vm453_vm6, %vm454_vm7  ;;  %vm475_vm12 = vsmask.f32 7942  ;;  %vm481_vm13 = vsmask.f32 1280  ;;  %vm833_vm6 = vsmask.f32 2306 }
  0x2a   :  { %1686 = vmatmul.mubr.msk.bf16.vlgmr.msra.gmra.mxu0 %vm110_vm2, %v282_v37  ;;  %v1825_v37 = vld [vmem:[%s2226_s1 + $0x94] ss:$12 sps:$4 sm:$0xff]   ;;  %vm449_vm10 = vmand %vm19_vm4, %vm448_vm8  ;;  %vm1136_vm8 = vcmask 254976   ;;  %s1890_s21 = smov [#allocation5]  }
  0x2b   :  { %1689 = vmatprep.mubr.msk.bf16.mxu0 %vm1886_vm0, %v1885_v0  ;;  %1722 = vmatpush3.bf16.msra.mxu0 %v1826_v35  ;;  %vm476_vm14 = vmand %vm474_vm11, %vm475_vm12 }
  0x2c   :  { %1699 = vmatprep.subr.bf16.mxu1 %v1825_v37  ;;  %vm2074_vm15 = vmand %vm22_vm5, %vm481_vm13 }
  0x2d   :  { %1700 = vmatpush3.bf16.msra.mxu1 %v1825_v37  ;;  %v1836_v37 = vld [vmem:[%s2226_s1 + $0x34] ss:$12 sps:$4 sm:$0xff]  }
  0x32   :  { %1690 = vmatmul.mubr.msk.bf16.gmra.mxu0 %vm110_vm2, %v284_v39  ;;  %v1829_v39 = vld [vmem:[%s2226_s1 + $0xdc] ss:$12 sps:$4 sm:$0xff]  }
  0x33   :  { %1693 = vmatprep.mubr.msk.bf16.mxu0 %vm1886_vm0, %v1885_v0 }
  0x3a   :  { %1694 = vmatmul.mubr.msk.bf16.gmra.mxu0 %vm110_vm2, %v283_v38  ;;  %v1827_v38 = vld [vmem:[%s2226_s1 + $0xf4] ss:$12 sps:$4 sm:$0xff]  }
  0x3b   :  { %1723 = vmatprep.subr.bf16.mxu0 %v1827_v38 }
  0x3c   :  { %1724 = vmatpush3.bf16.msra.mxu0 %v1827_v38  ;;  %v1837_v38 = vld [vmem:[%s2226_s1 + $0x1c] ss:$12 sps:$4 sm:$0xff]  }
  0x3d   :  { %1725 = vmatprep.subr.bf16.mxu0 %v1829_v39 }
  0x40   :  { %1726 = vmatpush3.bf16.msra.mxu0 %v1829_v39  ;;  %v1838_v39 = vld [vmem:[%s2226_s1 + $0x4] ss:$12 sps:$4 sm:$0xff]  }
  0xd2   :  { %v154_v40 = vpop.f32.mrf.mxu0  ;;  %v244_v41 = vpop.f32.mrf.mxu1 }
  0xd3   :  { %v245_v63 = vadd.f32 %v244_v41, %v154_v40  ;;  %v1828_v40 = vld [vmem:[%s2226_s1 + $0x7c] ss:$12 sps:$4 sm:$0xff]   ;;  %v1831_v41 = vld [vmem:[%s2226_s1 + $0xc4] ss:$12 sps:$4 sm:$0xff]  }
  0xd4   :  { %v1647_v42 = vpop.f32.mrf.mxu0  ;;  %v1667_v43 = vpop.f32.mrf.mxu1  ;;  %1701 = vmatprep.subr.bf16.mxu1 %v1828_v40  ;;  %1727 = vmatprep.subr.bf16.mxu0 %v1831_v41 }
  0xd5   :  { %v1830_v42 = vld [vmem:[%s2226_s1 + $0x64] ss:$12 sps:$4 sm:$0xff]   ;;  %1702 = vmatpush3.bf16.msra.mxu1 %v1828_v40  ;;  %1728 = vmatpush3.bf16.msra.mxu0 %v1831_v41  ;;  %v2062_v43 = vld [vmem:[%s2226_s1 + $0x4c] ss:$12 sps:$4 sm:$0xff]  }
  0xd6   :  { %v157_v44 = vpop.f32.mrf.mxu0  ;;  %v247_v45 = vpop.f32.mrf.mxu1  ;;  %1703 = vmatprep.subr.bf16.mxu1 %v1830_v42  ;;  %1745 = vmatprep.subr.bf16.mxu0 %v1885_v0 }
  0xd7   :  { %v248_v6 = vadd.f32 %v247_v45, %v157_v44 }
  0xd8   :  { %v1648_v46 = vpop.f32.mrf.mxu0  ;;  %v1668_v47 = vpop.f32.mrf.mxu1 }
  0xd9   :  { %1704 = vmatpush3.bf16.msra.mxu1 %v1830_v42 }
  0xda   :  { %v162_v48 = vpop.f32.mrf.mxu0  ;;  %v252_v49 = vpop.f32.mrf.mxu1  ;;  %1709 = vmatprep.subr.bf16.mxu1 %v2062_v43 }
  0xdb   :  { %v253_v12 = vadd.f32 %v252_v49, %v162_v48 }
  0xdc   :  { %v1651_v50 = vpop.f32.mrf.mxu0  ;;  %v1671_v51 = vpop.f32.mrf.mxu1 }
  0xde   :  { %v165_v52 = vpop.f32.mrf.mxu0  ;;  %v255_v53 = vpop.f32.mrf.mxu1 }
  0xdf   :  { %v256_v18 = vadd.f32 %v255_v53, %v165_v52 }
  0xe0   :  { %v1652_v54 = vpop.f32.mrf.mxu0  ;;  %v1672_v55 = vpop.f32.mrf.mxu1 }
  0xe2   :  { %v170_v56 = vpop.f32.mrf.mxu0  ;;  %v260_v57 = vpop.f32.mrf.mxu1 }
  0xe3   :  { %v261_v25 = vadd.f32 %v260_v57, %v170_v56 }
  0xe4   :  { %v1655_v58 = vpop.f32.mrf.mxu0  ;;  %v1675_v59 = vpop.f32.mrf.mxu1 }
  0xe6   :  { %v173_v60 = vpop.f32.mrf.mxu0  ;;  %v263_v61 = vpop.f32.mrf.mxu1 }
  0xe7   :  { %v450_v61 = vld [vmem:[#allocation2] sm:$0xf] }
  0xe8   :  { %v1656_v62 = vpop.f32.mrf.mxu0  ;;  %v1676_v1 = vpop.f32.mrf.mxu1 }
  0xe9   :  { %v456_v62 = vld [vmem:[#allocation2 + $0x4] sm:$0x1] }
  0xea   :  { %v352_v2 = vpop.f32.mrf.mxu0 }
  0xeb   :  { %v374_v4 = vadd.f32 %v352_v2, %v245_v63 }
  0xec   :  { %v1687_v5 = vpop.f32.mrf.mxu0 }
  0xed   :  { %v2016_v7 = vadd.f32 %v1473_v3, %v374_v4 }
  0xee   :  { %v355_v8 = vpop.f32.mrf.mxu0 }
  0xef   :  { %v375_v9 = vadd.f32 %v355_v8, %v248_v6  ;;  %v389_v10 = vmax.f32 %v2016_v7, 0.0 }
  0xf0   :  { %v1688_v11 = vpop.f32.mrf.mxu0 }
  0xf1   :  { %v2019_v13 = vadd.f32 %v1473_v3, %v375_v9  ;;  %399 = vrot.lane.b32.xlu0 %v389_v10, %s1887_s26 }
  0xf2   :  { %v360_v14 = vpop.f32.mrf.mxu0 }
  0xf3   :  { %v390_v15 = vmax.f32 %v2019_v13, 0.0  ;;  %v376_v16 = vadd.f32 %v360_v14, %v253_v12  ;;  %v477_v12 = vld [vmem:[#allocation2 + $0x4] sm:$0xe]  ;;  %v1850_v14 = vld [vmem:[%s2226_s1 + $0x110] ss:$12 sps:$4 sm:$0xff]  }
  0xf4   :  { %v1691_v17 = vpop.f32.mrf.mxu0 }
  0xf5   :  { %401 = vrot.lane.b32.xlu0 %v390_v15, %s1887_s26  ;;  %v386_v19 = vadd.f32 %v1473_v3, %v376_v16 }
  0xf6   :  { %v363_v21 = vpop.f32.mrf.mxu0 }
  0xf7   :  { %v377_v22 = vadd.f32 %v363_v21, %v256_v18  ;;  %v391_v23 = vmax.f32 %v386_v19, 0.0 }
  0xf8   :  { %v1692_v24 = vpop.f32.mrf.mxu0 }
  0xf9   :  { %v387_v26 = vadd.f32 %v1473_v3, %v377_v22  ;;  %403 = vrot.lane.b32.xlu1 %v391_v23, %s1887_s26 }
  0xfa   :  { %v368_v27 = vpop.f32.mrf.mxu0 }
  0xfb   :  { %v392_v28 = vmax.f32 %v387_v26, 0.0  ;;  %v378_v29 = vadd.f32 %v368_v27, %v261_v25 }
  0xfc   :  { %v1695_v30 = vpop.f32.mrf.mxu0 }
  0xfd   :  { %v388_v31 = vadd.f32 %v1473_v3, %v378_v29  ;;  %405 = vrot.lane.b32.xlu1 %v392_v28, %s1887_s26 }
  0xfe   :  { %v371_v32 = vpop.f32.mrf.mxu0 }
  0xff   :  { %v393_v33 = vmax.f32 %v388_v31, 0.0 }
 0x100   :  { %v1696_v34 = vpop.f32.mrf.mxu0 }
 0x101   :  { %407 = vrot.lane.b32.xlu0 %v393_v33, %s1887_s26 }
 0x163   :  { %v400_v44 = vpop.permute.xlu0 %399 }
 0x164   :  { %v414_v45 = vmax.f32 %v389_v10, %v400_v44 }
 0x166   :  { %419 = vst.msk [vmem:[#allocation4] sm:$0xff] %vm110_vm2, %v414_v45 }
 0x167   :  { %v402_v46 = vpop.permute.xlu0 %401 }
 0x168   :  { %v415_v47 = vmax.f32 %v390_v15, %v402_v46  ;;  %v483_v15 = vld [vmem:[#allocation2 + $0x8] sm:$0x3] }
 0x16a   :  { %420 = vst.msk [vmem:[#allocation4 + $0x8] sm:$0xff] %vm110_vm2, %v415_v47 }
 0x16b   :  { %v404_v48 = vpop.permute.xlu1 %403 }
 0x16c   :  { %v416_v49 = vmax.f32 %v391_v23, %v404_v48 }
 0x16e   :  { %421 = vst.msk [vmem:[#allocation4 + $0x10] sm:$0xff] %vm110_vm2, %v416_v49 }
 0x16f   :  { %v406_v50 = vpop.permute.xlu1 %405 }
 0x170   :  { %v417_v51 = vmax.f32 %v392_v28, %v406_v50 }
 0x171   :  { %v424_v52 = vld [vmem:[#allocation4] ss:$2 sm:$0xff]  ;;  %v426_v53 = vld [vmem:[#allocation4 + $0x1] ss:$2 sm:$0xff] }
 0x172   :  { %v427_v54 = vmax.f32 %v424_v52, %v426_v53  ;;  %422 = vst.msk [vmem:[#allocation4 + $0x18] sm:$0xff] %vm110_vm2, %v417_v51  ;;  %v1514_v51 = vld [vmem:[%s2228_s3 + $0x1] ss:$0 sm:$0xff] }
 0x173   :  { %v408_v55 = vpop.permute.xlu0 %407 }
 0x174   :  { %v1567_v56 = vpack.c.bf16 %v427_v54, %v427_v54  ;;  %v418_v57 = vmax.f32 %v393_v33, %v408_v55 }
 0x176   :  { %v438_v58 = vshrl.u32 %v1567_v56, 16  ;;  %423 = vst.msk [vmem:[#allocation4 + $0x20] sm:$0x3] %vm22_vm5, %v418_v57  ;;  %v441_v60 = vshll.u32 %v1567_v56, 16 }
 0x178   :  { %v440_v59 = vrot.slane %v438_v58, 7 }
 0x17a   :  { %v443_v63 = vor.u32 %v441_v60, %v440_v59  ;;  %v444_v1 = vrot.slane %v440_v59, 4 }
 0x17c   :  { %v451_v2 = vsel %vm449_vm10, %v443_v63, %v450_v61  ;;  %v457_v3 = vsel %vm455_vm9, %v444_v1, %v456_v62  ;;  %vm1151_vm9 = vcmask 1040384  }
 0x17d   :  { %v429_v4 = vld [vmem:[#allocation4 + $0x12] ss:$2 sm:$0xff]  ;;  %v431_v5 = vld [vmem:[#allocation4 + $0x13] ss:$2 sm:$0xff]  ;;  %452 = vst [vmem:[#allocation2] sm:$0xf] %v451_v2 }
 0x17e   :  { %458 = vst [vmem:[#allocation2 + $0x4] sm:$0x1] %v457_v3  ;;  %v432_v6 = vmax.f32 %v429_v4, %v431_v5  ;;  %v1840_v3 = vld [vmem:[%s2226_s1 + $0x50] ss:$12 sps:$4 sm:$0xff]   ;;  %v1841_v4 = vld [vmem:[%s2226_s1 + $0x38] ss:$12 sps:$4 sm:$0xff]  }
 0x17f   :  { %v1842_v5 = vld [vmem:[%s2226_s1 + $0xb0] ss:$12 sps:$4 sm:$0xff]  }
 0x180   :  { %v1568_v7 = vpack.c.bf16 %v432_v6, %v432_v6  ;;  %v1844_v6 = vld [vmem:[%s2226_s1 + $0x98] ss:$12 sps:$4 sm:$0xff]  }
 0x182   :  { %v464_v8 = vshrl.u32 %v1568_v7, 16  ;;  %v467_v9 = vshll.u32 %v1568_v7, 16  ;;  %v1843_v7 = vld [vmem:[%s2226_s1 + $0x20] ss:$12 sps:$4 sm:$0xff]  }
 0x184   :  { %v466_v10 = vrot.slane %v464_v8, 6  ;;  %v469_v11 = vrot.slane %v467_v9, 7  ;;  %v486_v19 = vld [vmem:[#allocation2] sm:$0xf]  ;;  %v1845_v9 = vld [vmem:[%s2226_s1 + $0x8] ss:$12 sps:$4 sm:$0xff]  }
 0x185   :  { %v687_v21 = vld [vmem:[#allocation2] sm:$0xe] }
 0x186   :  { %v470_v13 = vor.u32 %v469_v11, %v466_v10  ;;  %v1846_v8 = vld [vmem:[%s2226_s1 + $0x80] ss:$12 sps:$4 sm:$0xff]   ;;  %v1849_v10 = vld [vmem:[%s2226_s1 + $0x68] ss:$12 sps:$4 sm:$0xff]  }
 0x188   :  { %v471_v16 = vrot.slane %v470_v13, 4  ;;  %v478_v17 = vsel %vm476_vm14, %v470_v13, %v477_v12 }
 0x189   :  { %479 = vst [vmem:[#allocation2 + $0x4] sm:$0xe] %v478_v17 }
 0x18a   :  { %v484_v18 = vsel %vm2074_vm15, %v471_v16, %v483_v15 }
 0x18b   :  { %485 = vst [vmem:[#allocation2 + $0x8] sm:$0x3] %v484_v18 }
 0x190   :  { %v487_v20 = vld [vmem:[#allocation2 + $0x4] sm:$0xf] }
 0x191   :  { %v1484_v22 = vcombine.low %v486_v19, %v487_v20  ;;  %v1507_v23 = vcombine.low %v687_v21, %v487_v20 }
 0x192   :  { %v1833_v24 = vld [vmem:[#allocation2 + $0x8] ss:$0 sps:$4 sm:$0x33]  }
 0x193   :  { %v699_v25 = vrot.slane %v1507_v23, 1  ;;  %v517_v26 = vshll.u32 %v1484_v22, 16  ;;  %v700_v27 = vrot.slane %v1833_v24, 1  ;;  %v522_v28 = vshll.u32 %v1833_v24, 16 }
 0x194   :  { %v515_v29 = vshrl.u32 %v1484_v22, 16  ;;  %v526_v33 = vshrl.u32 %v1833_v24, 16  ;;  %v1839_v40 = vld [vmem:[#allocation2 + $0x8] ss:$0 sps:$4 sm:$0x11]  }
 0x195   :  { %v519_v30 = vrot.slane %v517_v26, 1  ;;  %v701_v31 = vsel %vm279_vm3, %v699_v25, %v700_v27  ;;  %v524_v32 = vrot.slane %v522_v28, 1  ;;  %vm854_vm3 = vsmask.f32 7950 }
 0x196   :  { %1729 = vmatprep.mubr.msk.bf16.mxu0 %vm110_vm2, %v701_v31 }
 0x197   :  { %v520_v34 = vor.u32 %v519_v30, %v515_v29  ;;  %1730 = vmatmul.mubr.msk.bf16.vlgmr.msra.gmra.mxu0 %vm110_vm2, %v700_v27  ;;  %v528_v35 = vor.u32 %v526_v33, %v524_v32  ;;  %v856_v27 = vld [vmem:[#allocation3] sm:$0x8] }
 0x198   :  { %1753 = vmatprep.mubr.msk.bf16.mxu0 %vm1886_vm0, %v1885_v0  ;;  %1746 = vmatpush3.bf16.msra.mxu0 %v1840_v3 }
 0x199   :  { %v525_v36 = vsel %vm62_vm1, %v520_v34, %v524_v32  ;;  %1747 = vmatprep.subr.bf16.mxu0 %v1885_v0  ;;  %vm853_vm1 = vcmask 519171   ;;  %v859_v34 = vld [vmem:[#allocation3 + $0x4] sm:$0x3] }
 0x19a   :  { %1705 = vmatprep.mubr.msk.bf16.mxu1 %vm110_vm2, %v525_v36  ;;  %vm855_vm4 = vmand %vm853_vm1, %vm854_vm3 }
 0x19b   :  { %1706 = vmatmul.mubr.msk.bf16.vlgmr.msra.gmra.mxu1 %vm110_vm2, %v528_v35 }
 0x19c   :  { %1710 = vmatpush3.bf16.msra.mxu1 %v2062_v43  ;;  %1717 = vmatprep.mubr.msk.bf16.mxu1 %vm110_vm2, %v1484_v22 }
 0x19d   :  { %1711 = vmatprep.subr.bf16.mxu1 %v1836_v37  ;;  %1748 = vmatpush3.bf16.msra.mxu0 %v1841_v4  ;;  %v1551_v4 = vld [vmem:[%s2228_s3 + $0x2] ss:$0 sm:$0xff] }
 0x19e   :  { %1749 = vmatprep.subr.bf16.mxu0 %v1885_v0 }
 0x1a0   :  { %1712 = vmatpush3.bf16.msra.mxu1 %v1836_v37 }
 0x1a1   :  { %1713 = vmatprep.subr.bf16.mxu1 %v1837_v38  ;;  %1750 = vmatpush3.bf16.msra.mxu0 %v1843_v7 }
 0x1a2   :  { %1751 = vmatprep.subr.bf16.mxu0 %v1885_v0 }
 0x1a4   :  { %1714 = vmatpush3.bf16.msra.mxu1 %v1837_v38  ;;  %v835_v38 = vld [vmem:[#allocation3] sm:$0x7] }
 0x1a5   :  { %1715 = vmatprep.subr.bf16.mxu1 %v1838_v39  ;;  %1752 = vmatpush3.bf16.msra.mxu0 %v1845_v9 }
 0x1a6   :  { %1769 = vmatprep.subr.bf16.mxu0 %v1885_v0 }
 0x1a8   :  { %1716 = vmatpush3.bf16.msra.mxu1 %v1838_v39 }
 0x1a9   :  { %1733 = vmatprep.subr.bf16.mxu1 %v1885_v0 }
 0x1ab   :  { %1718 = vmatmul.mubr.msk.bf16.vlgmr.msra.gmra.mxu1 %vm110_vm2, %v1839_v40 }
 0x1ac   :  { %1741 = vmatprep.mubr.msk.bf16.mxu1 %vm1886_vm0, %v1885_v0  ;;  %1734 = vmatpush3.bf16.msra.mxu1 %v1842_v5  ;;  %v1855_v5 = vld [vmem:[%s2227_s2 + $0x18] sm:$0xff]  }
 0x1ad   :  { %1735 = vmatprep.subr.bf16.mxu1 %v1885_v0 }
 0x1b0   :  { %1736 = vmatpush3.bf16.msra.mxu1 %v1844_v6 }
 0x1b1   :  { %1737 = vmatprep.subr.bf16.mxu1 %v1885_v0 }
 0x1b4   :  { %1738 = vmatpush3.bf16.msra.mxu1 %v1846_v8  ;;  %v1856_v8 = vld [vmem:[%s2227_s2 + $0x10] sm:$0xff]  }
 0x1b5   :  { %1739 = vmatprep.subr.bf16.mxu1 %v1885_v0 }
 0x1b8   :  { %1740 = vmatpush3.bf16.msra.mxu1 %v1849_v10 }
 0x1b9   :  { %1757 = vmatprep.subr.bf16.mxu1 %v1885_v0 }
 0x257   :  { %v1731_v41 = vpop.f32.mrf.mxu0 }
 0x259   :  { %v766_v42 = vpop.f32.mrf.mxu0 }
 0x25b   :  { %v1707_v43 = vpop.f32.mrf.mxu1  ;;  %v1732_v44 = vpop.f32.mrf.mxu0 }
 0x25d   :  { %v593_v45 = vpop.f32.mrf.mxu1  ;;  %v769_v59 = vpop.f32.mrf.mxu0 }
 0x25f   :  { %v1708_v46 = vpop.f32.mrf.mxu1 }
 0x261   :  { %v596_v47 = vpop.f32.mrf.mxu1 }
 0x26b   :  { %v1719_v48 = vpop.f32.mrf.mxu1 }
 0x26c   :  { %v682_v49 = vadd.f32 %v1719_v48, %v1707_v43 }
 0x26d   :  { %v673_v50 = vpop.f32.mrf.mxu1 }
 0x26e   :  { %v782_v52 = vadd.f32 %v1731_v41, %v682_v49  ;;  %v674_v54 = vadd.f32 %v673_v50, %v593_v45 }
 0x26f   :  { %v1720_v53 = vpop.f32.mrf.mxu1 }
 0x270   :  { %v790_v55 = vadd.f32 %v1514_v51, %v782_v52  ;;  %v780_v60 = vadd.f32 %v766_v42, %v674_v54  ;;  %v1852_v52 = vld [vmem:[%s2226_s1 + $0xe0] ss:$12 sps:$4 sm:$0xff]   ;;  %v1853_v54 = vld [vmem:[%s2226_s1 + $0xc8] ss:$12 sps:$4 sm:$0xff]  }
 0x271   :  { %v676_v56 = vpop.f32.mrf.mxu1 }
 0x272   :  { %v677_v57 = vadd.f32 %v676_v56, %v596_v47  ;;  %v793_v58 = vmax.f32 %v790_v55, 0.0  ;;  %v788_v1 = vadd.f32 %v1514_v51, %v780_v60 }
 0x274   :  { %v781_v61 = vadd.f32 %v769_v59, %v677_v57  ;;  %801 = vrot.lane.b32.xlu0 %v793_v58, %s1887_s26  ;;  %v791_v2 = vmax.f32 %v788_v1, 0.0 }
 0x276   :  { %v789_v62 = vadd.f32 %v1514_v51, %v781_v61  ;;  %v1851_v51 = vld [vmem:[%s2226_s1 + $0xf8] ss:$12 sps:$4 sm:$0xff]  }
 0x278   :  { %v792_v63 = vmax.f32 %v789_v62, 0.0 }
 0x27a   :  { %799 = vrot.lane.b32.xlu1 %v792_v63, %s1887_s26 }
 0x27e   :  { %797 = vrot.lane.b32.xlu1 %v791_v2, %s1887_s26 }
 0x2e6   :  { %v802_v11 = vpop.permute.xlu0 %801 }
 0x2e7   :  { %v808_v12 = vmax.f32 %v793_v58, %v802_v11 }
 0x2e9   :  { %811 = vst.msk [vmem:[#allocation4 + $0x10] sm:$0x3] %vm22_vm5, %v808_v12  ;;  %vm832_vm5 = vcmask 518144  }
 0x2ea   :  { %vm834_vm7 = vmand %vm832_vm5, %vm833_vm6 }
 0x2ec   :  { %v800_v13 = vpop.permute.xlu1 %799 }
 0x2ed   :  { %v807_v15 = vmax.f32 %v792_v63, %v800_v13 }
 0x2ef   :  { %810 = vst.msk [vmem:[#allocation4 + $0x8] sm:$0xff] %vm110_vm2, %v807_v15 }
 0x2f0   :  { %v798_v16 = vpop.permute.xlu1 %797 }
 0x2f1   :  { %v806_v17 = vmax.f32 %v791_v2, %v798_v16 }
 0x2f3   :  { %809 = vst.msk [vmem:[#allocation4] sm:$0xff] %vm110_vm2, %v806_v17 }
 0x2f6   :  { %v816_v18 = vld [vmem:[#allocation4 + $0xa] ss:$2 sm:$0xf]  ;;  %v818_v19 = vld [vmem:[#allocation4 + $0xb] ss:$2 sm:$0xf] }
 0x2f7   :  { %v819_v20 = vmax.f32 %v816_v18, %v818_v19 }
 0x2f9   :  { %v1570_v21 = vpack.c.bf16 %v819_v20, %v819_v20 }
 0x2fa   :  { %v812_v22 = vld [vmem:[#allocation4] ss:$2 sm:$0xf]  ;;  %v813_v23 = vld [vmem:[#allocation4 + $0x1] ss:$2 sm:$0xf] }
 0x2fb   :  { %v843_v24 = vshll.u32 %v1570_v21, 16  ;;  %v846_v25 = vshrl.u32 %v1570_v21, 16  ;;  %v814_v26 = vmax.f32 %v812_v22, %v813_v23 }
 0x2fd   :  { %v845_v28 = vrot.slane %v843_v24, 5  ;;  %v848_v29 = vrot.slane %v846_v25, 4  ;;  %v1569_v30 = vpack.c.bf16 %v814_v26, %v814_v26 }
 0x2ff   :  { %v849_v31 = vor.u32 %v848_v29, %v845_v28  ;;  %v825_v32 = vshrl.u32 %v1569_v30, 16  ;;  %v857_v33 = vsel %vm855_vm4, %v845_v28, %v856_v27  ;;  %v828_v37 = vshll.u32 %v1569_v30, 16 }
 0x300   :  { %858 = vst [vmem:[#allocation3] sm:$0x8] %v857_v33 }
 0x301   :  { %v850_v35 = vrot.slane %v849_v31, 4  ;;  %v827_v36 = vrot.slane %v825_v32, 7  ;;  %v1857_v32 = vld [vmem:[%s2227_s2 + $0x8] sm:$0xff]  }
 0x303   :  { %v830_v39 = vor.u32 %v828_v37, %v827_v36  ;;  %v860_v40 = vsel %vm2074_vm15, %v850_v35, %v859_v34  ;;  %v1858_v35 = vld [vmem:[%s2227_s2] sm:$0xff]  }
 0x304   :  { %861 = vst [vmem:[#allocation3 + $0x4] sm:$0x3] %v860_v40 }
 0x305   :  { %v836_v41 = vsel %vm834_vm7, %v830_v39, %v835_v38  ;;  %v1859_v38 = vld [vmem:[%s2227_s2 + $0x28] sm:$0xff]   ;;  %v1860_v39 = vld [vmem:[%s2227_s2 + $0x20] sm:$0xff]  }
 0x306   :  { %837 = vst [vmem:[#allocation3] sm:$0x7] %v836_v41 }
 0x30b   :  { %v863_v43 = vld [vmem:[#allocation3 + $0x4] sm:$0x1] }
 0x30c   :  { %v872_v44 = vld [vmem:[#allocation3 + $0x4] sm:$0x3] }
 0x30d   :  { %v862_v42 = vld [vmem:[#allocation3] sm:$0xf] }
 0x30e   :  { %v1525_v45 = vcombine.low %v862_v42, %v872_v44  ;;  %v1531_v46 = vcombine.low %v862_v42, %v863_v43  ;;  %v1032_v53 = vld [vmem:[#allocation3] sm:$0xe] }
 0x30f   :  { %v1545_v55 = vcombine.low %v1032_v53, %v872_v44  ;;  %v1862_v53 = vld [vmem:[%s2227_s2 + $0x30] sm:$0xff]  }
 0x310   :  { %1754 = vmatmul.mubr.msk.bf16.vlgmr.msra.gmra.mxu0 %vm110_vm2, %v1531_v46  ;;  %v889_v47 = vshll.u32 %v1525_v45, 16  ;;  %v887_v48 = vshrl.u32 %v1525_v45, 16  ;;  %v1558_v45 = vld [vmem:[%s2228_s3 + $0x3] ss:$0 sm:$0xff] }
 0x311   :  { %1773 = vmatprep.mubr.msk.bf16.mxu0 %vm1886_vm0, %v1885_v0  ;;  %v1044_v56 = vrot.slane %v1545_v55, 1  ;;  %1770 = vmatpush3.bf16.msra.mxu0 %v1855_v5 }
 0x312   :  { %v891_v49 = vrot.slane %v889_v47, 1  ;;  %1771 = vmatprep.subr.bf16.mxu0 %v1885_v0 }
 0x314   :  { %v892_v50 = vor.u32 %v891_v49, %v887_v48 }
 0x315   :  { %1772 = vmatpush3.bf16.msra.mxu0 %v1856_v8 }
 0x316   :  { %1742 = vmatmul.mubr.msk.bf16.vlgmr.msra.gmra.mxu1 %vm110_vm2, %v892_v50  ;;  %1777 = vmatprep.subr.bf16.mxu0 %v1885_v0 }
 0x317   :  { %1758 = vmatpush3.bf16.msra.mxu1 %v1850_v14  ;;  %1765 = vmatprep.mubr.msk.bf16.mxu1 %vm1886_vm0, %v1885_v0 }
 0x318   :  { %1759 = vmatprep.subr.bf16.mxu1 %v1885_v0 }
 0x31b   :  { %1760 = vmatpush3.bf16.msra.mxu1 %v1851_v51 }
 0x31c   :  { %1761 = vmatprep.subr.bf16.mxu1 %v1885_v0 }
 0x31f   :  { %1762 = vmatpush3.bf16.msra.mxu1 %v1852_v52  ;;  %v1861_v52 = vld [vmem:[%s2227_s2 + $0x38] sm:$0xff]   ;;  %s1423_s2 = sshll.u32 %s1890_s21, 4  ;;  %s1424_s2 = int_to_ptr.vmem [resolvable:$true] %s1423_s2 }
 0x320   :  { %1763 = vmatprep.subr.bf16.mxu1 %v1885_v0  ;;  %s1863_s22 = scalar_lea.vmem %s1424_s2, 32  ;;  %p1868_p1 = scmp.lt.s32.totalorder %s1424_s2, %s1424_s2 }
 0x321   :  { %p1864_p0 = scmp.ne.s32.totalorder %s1424_s2, %s1863_s22  ;;  %p1869_p2 = scmp.lt.s32.totalorder %s1863_s22, %s1863_s22 }
 0x323   :  { %1764 = vmatpush3.bf16.msra.mxu1 %v1853_v54  ;;  %v1559_v54 = vld [vmem:[%s2228_s3 + $0x4] ss:$0 sm:$0xff]  ;;  %p1870_p3 = por %p1869_p2, %p1868_p1 }
 0x324   :  { %1785 = vmatprep.subr.bf16.mxu1 %v1885_v0 }
 0x325   :  { %p1871_p4 = pnand %p1870_p3, %p1864_p0 }
 0x326   :  { %1766 = vmatmul.mubr.msk.bf16.vlgmr.msra.gmra.mxu1 %vm110_vm2, %v1044_v56  ;;  %vm1134_vm2 = vcmask 261120  }
 0x327   :  { %1789 = vmatprep.mubr.msk.bf16.mxu1 %vm1886_vm0, %v1885_v0  ;;  %1786 = vmatpush3.bf16.msra.mxu1 %v1859_v38 }
 0x328   :  { %1787 = vmatprep.subr.bf16.mxu1 %v1885_v0 }
 0x32b   :  { %1788 = vmatpush3.bf16.msra.mxu1 %v1860_v39 }
 0x3d0   :  { %v1025_v57 = vpop.f32.mrf.mxu0 }
 0x3d2   :  { %v1755_v58 = vpop.f32.mrf.mxu0 }
 0x3d4   :  { %v1028_v59 = vpop.f32.mrf.mxu0 }
 0x3d6   :  { %v954_v60 = vpop.f32.mrf.mxu1  ;;  %v1756_v61 = vpop.f32.mrf.mxu0 }
 0x3d7   :  { %v1026_v2 = vadd.f32 %v1025_v57, %v954_v60 }
 0x3d8   :  { %v1743_v62 = vpop.f32.mrf.mxu1 }
 0x3da   :  { %v957_v63 = vpop.f32.mrf.mxu1 }
 0x3db   :  { %v1029_v9 = vadd.f32 %v1028_v59, %v957_v63 }
 0x3dc   :  { %v1744_v1 = vpop.f32.mrf.mxu1 }
 0x3e6   :  { %v1106_v3 = vpop.f32.mrf.mxu1 }
 0x3e7   :  { %v1113_v6 = vadd.f32 %v1106_v3, %v1026_v2 }
 0x3e8   :  { %v1767_v7 = vpop.f32.mrf.mxu1 }
 0x3e9   :  { %v1120_v10 = vadd.f32 %v1551_v4, %v1113_v6 }
 0x3ea   :  { %v1109_v11 = vpop.f32.mrf.mxu1 }
 0x3eb   :  { %v1122_v12 = vmax.f32 %v1120_v10, 0.0  ;;  %v1114_v13 = vadd.f32 %v1109_v11, %v1029_v9 }
 0x3ec   :  { %v1768_v15 = vpop.f32.mrf.mxu1 }
 0x3ed   :  { %v1121_v16 = vadd.f32 %v1551_v4, %v1114_v13  ;;  %1126 = vrot.lane.b32.xlu0 %v1122_v12, %s1889_s29 }
 0x3ef   :  { %v1123_v17 = vmax.f32 %v1121_v16, 0.0 }
 0x3f1   :  { %1128 = vrot.lane.b32.xlu1 %v1123_v17, %s1889_s29 }
 0x45f   :  { %v1127_v18 = vpop.permute.xlu0 %1126 }
 0x460   :  { %v1132_v19 = vadd.f32 %v1127_v18, %v1122_v12 }
 0x462   :  { %1135 = vst.msk [vmem:[#allocation4] sm:$0xff] %vm1134_vm2, %v1132_v19 }
 0x463   :  { %v1129_v20 = vpop.permute.xlu1 %1128 }
 0x464   :  { %v1133_v21 = vadd.f32 %v1129_v20, %v1123_v17 }
 0x466   :  { %1137 = vst.msk [vmem:[#allocation4 + $0x8] sm:$0x3] %vm1136_vm8, %v1133_v21 }
 0x469   :  { %v1138_v22 = vld [vmem:[#allocation4] ss:$2 sm:$0x3]  ;;  %v1139_v23 = vld [vmem:[#allocation4 + $0x1] ss:$2 sm:$0x3] }
 0x46a   :  { %v1140_v24 = vadd.f32 %v1139_v23, %v1138_v22 }
 0x46c   :  { %v1141_v25 = vmul.f32 0.25, %v1140_v24 }
 0x46d   :  { %v1143_v26 = vld [vmem:[#allocation4 + $0x6] ss:$2 sm:$0x3]  ;;  %v1145_v27 = vld [vmem:[#allocation4 + $0x7] ss:$2 sm:$0x3] }
 0x46e   :  { %v1146_v28 = vadd.f32 %v1145_v27, %v1143_v26  ;;  %v1155_v30 = vrot.slane %v1141_v25, 1 }
 0x470   :  { %v1147_v29 = vmul.f32 0.25, %v1146_v28 }
 0x472   :  { %v1157_v31 = vsel %vm1151_vm9, %v1155_v30, %v1147_v29  ;;  %v1149_v34 = vrot.slane %v1147_v29, 7 }
 0x473   :  { %v1158_v33 = vpack.c.bf16 %v1157_v31, %v1157_v31 }
 0x474   :  { %v1152_v36 = vsel %vm1151_vm9, %v1141_v25, %v1149_v34 }
 0x475   :  { %1774 = vmatmul.mubr.msk.bf16.vlgmr.msra.gmra.mxu0 %vm1134_vm2, %v1158_v33  ;;  %v1153_v37 = vpack.c.bf16 %v1152_v36, %v1152_v36 }
 0x476   :  { %1778 = vmatpush3.bf16.msra.mxu0 %v1857_v32  ;;  %1781 = vmatprep.mubr.msk.bf16.mxu0 %vm1886_vm0, %v1885_v0 }
 0x477   :  { %1779 = vmatprep.subr.bf16.mxu0 %v1885_v0 }
 0x47a   :  { %1780 = vmatpush3.bf16.msra.mxu0 %v1858_v35 }
 0x47b   :  { %1793 = vmatprep.subr.bf16.mxu0 %v1885_v0 }
 0x47d   :  { %1782 = vmatmul.mubr.msk.bf16.vlgmr.msra.gmra.mxu0 %vm1134_vm2, %v1153_v37 }
 0x47e   :  { %1797 = vmatprep.mubr.msk.bf16.mxu0 %vm1886_vm0, %v1885_v0  ;;  %1794 = vmatpush3.bf16.msra.mxu0 %v1861_v52  ;;  %vm1415_vm0 = vcmask 33792  }
 0x47f   :  { %1795 = vmatprep.subr.bf16.mxu0 %v1885_v0  ;;  %v1563_v0 = vld [vmem:[%s2228_s3 + $0x5] ss:$0 sm:$0xff] }
 0x482   :  { %1796 = vmatpush3.bf16.msra.mxu0 %v1862_v53 }
 0x535   :  { %v1216_v40 = vpop.f32.mrf.mxu0 }
 0x537   :  { %v1775_v41 = vpop.f32.mrf.mxu0 }
 0x539   :  { %v1219_v42 = vpop.f32.mrf.mxu0 }
 0x53b   :  { %v1776_v43 = vpop.f32.mrf.mxu0 }
 0x53d   :  { %v1271_v44 = vpop.f32.mrf.mxu0 }
 0x53e   :  { %v1272_v46 = vadd.f32 %v1271_v44, %v1216_v40 }
 0x53f   :  { %v1783_v47 = vpop.f32.mrf.mxu0 }
 0x540   :  { %v1282_v48 = vadd.f32 %v1558_v45, %v1272_v46 }
 0x541   :  { %v1274_v49 = vpop.f32.mrf.mxu0 }
 0x542   :  { %v1283_v14 = vmax.f32 %v1282_v48, 0.0 }
 0x543   :  { %v1784_v50 = vpop.f32.mrf.mxu0 }
 0x544   :  { %v1284_v51 = vpack.c.bf16 %v1283_v14, %v1283_v14 }
 0x546   :  { %1790 = vmatmul.mubr.msk.bf16.vlgmr.msra.gmra.mxu1 %vm1134_vm2, %v1284_v51 }
 0x606   :  { %v1343_v55 = vpop.f32.mrf.mxu1 }
 0x607   :  { %v1344_v56 = vadd.f32 %v1559_v54, %v1343_v55 }
 0x608   :  { %v1791_v57 = vpop.f32.mrf.mxu1 }
 0x609   :  { %v1349_v58 = vmax.f32 %v1344_v56, 0.0 }
 0x60a   :  { %v1346_v59 = vpop.f32.mrf.mxu1 }
 0x60b   :  { %v1350_v60 = vpack.c.bf16 %v1349_v58, %v1349_v58 }
 0x60c   :  { %v1792_v61 = vpop.f32.mrf.mxu1 }
 0x60d   :  { %1798 = vmatmul.mubr.msk.bf16.vlgmr.msra.gmra.mxu0 %vm1134_vm2, %v1350_v60 }
 0x6cd   :  { %v1409_v62 = vpop.f32.mrf.mxu0 }
 0x6ce   :  { %v1410_v63 = vadd.f32 %v1563_v0, %v1409_v62 }
 0x6cf   :  { %v1799_v1 = vpop.f32.mrf.mxu0 }
 0x6d0   :  { %1416 = vst.msk [vmem:[#allocation5] sm:$0x3] %vm1415_vm0, %v1410_v63 }
 0x6d1   :  { %v1412_v2 = vpop.f32.mrf.mxu0 }
 0x6d2   :  { %1874 = shalt.err (!%p1871_p4)
}
 0x6d3   :  { %1426 = dma.vmem_to_hbm [thread:$0]  %s1424_s2, 32, %s2229_s4, [#allocation6]   ;;  %v1800_v3 = vpop.f32.mrf.mxu0 }
 0x6d4   :  { %1883 = dma.done.wait [#allocation6], 32  }
 0x6d5   :  { %1884 = vsyncadd [#allocation6], 4294967264 }
 0x6d6   :  { %1430 = vsyncpa [#allocation6], 1 }

</bundles_post_ra>
